<compile_context>
chip_gen: v6e
topology: v6e:2x2x1
jax: 0.10.0
libtpu: 0.0.40
codegen_flags: <defaults>
</compile_context>

<pallas_src>
import jax
import jax.numpy as jnp
from jax.experimental import pallas as pl
from jax.experimental.pallas import tpu as pltpu


# ---------------------------------------------------------------------------
# Tiling helpers
# ---------------------------------------------------------------------------
_LANE = 128
_VMEM_LIMIT = 32 * 1024 * 1024   # explicit, fits v5e/v6e/v7x scoped VMEM


def _pad_tile(M, max_tile):
    """Pad M to a multiple of 128; pick a lane-aligned tile dividing it.

    Prefer >= 2 point tiles (v7x megacore) whenever Mp >= 256.
    """
    Mp = ((M + _LANE - 1) // _LANE) * _LANE
    cap = min(max_tile, Mp if Mp < 2 * _LANE else Mp // 2)
    T = (cap // _LANE) * _LANE
    while Mp % T:
        T -= _LANE
    return Mp, T


# ---------------------------------------------------------------------------
# Pallas kernels
# ---------------------------------------------------------------------------
def _make_sa_kernel(ns, n_layers):
    """Shared MLP (1x1 conv, BN folded) + max over nsample, channels-first.

    refs = (grouped, w1, b1, ..., wn, bn, out)
      grouped: (1, ns, C_in, T)      bf16   (lane axis = points)
      w_l:     (1, C_{l+1}, C_l)     bf16   (transposed, BN scale folded in)
      b_l:     (1, C_{l+1}, 1)       f32    (BN shift)
      out:     (1, C_out, T)         f32    (lane-dense, no transpose)
    """
    def kernel(*refs):
        g_ref, o_ref = refs[0], refs[-1]
        params = refs[1:-1]
        # Hoist the (tiny) weights/biases out of the neighbour loop.
        ws = [params[2 * l][0] for l in range(n_layers)]
        bs = [params[2 * l + 1][0] for l in range(n_layers)]

        def one_neighbor(j):
            h = g_ref[0, j]                                   # (C_in, T) bf16
            for l in range(n_layers - 1):
                z = jnp.dot(ws[l], h, preferred_element_type=jnp.float32)
                h = jnp.maximum(z + bs[l], 0.0).astype(jnp.bfloat16)
            # Last layer: bias + ReLU hoisted past the max-pool.
            return jnp.dot(ws[-1], h, preferred_element_type=jnp.float32)

        acc0 = one_neighbor(0)                                # (C_out, T) f32
        acc = jax.lax.fori_loop(
            1, ns, lambda j, a: jnp.maximum(a, one_neighbor(j)), acc0)
        o_ref[0] = jnp.maximum(acc + bs[-1], 0.0)
    return kernel


def _make_fp_kernel(n_layers):
    """Fused shared MLP on channels-first columns, lane-dense output.

    refs = (x, w1, b1, ..., wn, bn, out)
      x:   (C_in, T) bf16;  w_l: (C_{l+1}, C_l) bf16;  b_l: (C_{l+1}, 1) f32
      out: (C_out, T) f32
    """
    def kernel(*refs):
        x_ref, o_ref = refs[0], refs[-1]
        params = refs[1:-1]
        h = x_ref[...]
        for l in range(n_layers):
            w, b = params[2 * l][...], params[2 * l + 1][...]
            z = jnp.dot(w, h, preferred_element_type=jnp.float32)
            h = jnp.maximum(z + b, 0.0)
            if l + 1 < n_layers:
                h = h.astype(jnp.bfloat16)
        o_ref[...] = h
    return kernel


# ---------------------------------------------------------------------------
# Pallas wrappers
# ---------------------------------------------------------------------------
def sa_mlp_maxpool_msg(g, params, max_tile=256):
    """All MSG scales of one SA level in a single pallas_call.

    g:      (S, ns, C_in, M) grouped features, channels-first, point-minor.
    params: dict with pre-built 'w' [(S, co, ci) bf16], 'b' [(S, co, 1) f32],
            'couts', 'n_layers' (built once in build_params).
    Returns (S, C_out_max, M_pad) f32.
    """
    S, ns, cin, M = g.shape
    n_layers = params['n_layers']
    w_list, b_list = params['w'], params['b']
    cout_max = w_list[-1].shape[1]

    Mp, T = _pad_tile(M, max_tile)
    g = jnp.pad(g, ((0, 0), (0, 0), (0, 0), (0, Mp - M))).astype(jnp.bfloat16)

    args = [g]
    in_specs = [pl.BlockSpec((1, ns, cin, T), lambda s, i: (s, 0, 0, i))]
    for l in range(n_layers):
        w, b = w_list[l], b_list[l]
        args += [w, b]
        in_specs += [pl.BlockSpec((1,) + w.shape[1:], lambda s, i: (s, 0, 0)),
                     pl.BlockSpec((1,) + b.shape[1:], lambda s, i: (s, 0, 0))]

    flops = int(2 * Mp * ns * S *
                sum(int(w.shape[1]) * int(w.shape[2]) for w in w_list))
    bytes_acc = int(sum(int(a.size) * a.dtype.itemsize for a in args)
                    + S * cout_max * Mp * 4)

    out = pl.pallas_call(
        _make_sa_kernel(ns, n_layers),
        out_shape=jax.ShapeDtypeStruct((S, cout_max, Mp), jnp.float32),
        grid=(S, Mp // T),
        in_specs=in_specs,
        out_specs=pl.BlockSpec((1, cout_max, T), lambda s, i: (s, 0, i)),
        compiler_params=pltpu.CompilerParams(
            dimension_semantics=("parallel", "parallel"),
            vmem_limit_bytes=_VMEM_LIMIT),
        cost_estimate=pl.CostEstimate(flops=flops, transcendentals=0,
                                      bytes_accessed=bytes_acc),
    )(*args)
    return out


def fp_mlp(x_cf, layers, max_tile=512):
    """x_cf: (C_in, M) channels-first; layers: [(W^T bf16, shift f32), ...].

    Returns (C_out, M) f32.
    """
    cin, M = x_cf.shape
    n_layers = len(layers)
    cout = layers[-1][0].shape[0]
    Mp, T = _pad_tile(M, max_tile)
    xp = jnp.pad(x_cf, ((0, 0), (0, Mp - M))).astype(jnp.bfloat16)

    args = [xp]
    in_specs = [pl.BlockSpec((cin, T), lambda i: (0, i))]
    for (w, b) in layers:
        args += [w, b]
        in_specs += [pl.BlockSpec(w.shape, lambda i: (0, 0)),
                     pl.BlockSpec(b.shape, lambda i: (0, 0))]

    flops = int(2 * Mp * sum(int(w.shape[0]) * int(w.shape[1]) for (w, _) in layers))
    bytes_acc = int(sum(int(a.size) * a.dtype.itemsize for a in args)
                    + cout * Mp * 4)

    out = pl.pallas_call(
        _make_fp_kernel(n_layers),
        out_shape=jax.ShapeDtypeStruct((cout, Mp), jnp.float32),
        grid=(Mp // T,),
        in_specs=in_specs,
        out_specs=pl.BlockSpec((cout, T), lambda i: (0, i)),
        compiler_params=pltpu.CompilerParams(
            dimension_semantics=("parallel",),
            vmem_limit_bytes=_VMEM_LIMIT),
        cost_estimate=pl.CostEstimate(flops=flops, transcendentals=0,
                                      bytes_accessed=bytes_acc),
    )(*args)
    return out[:, :M]


# ---------------------------------------------------------------------------
# JAX glue (data-dependent index generation, gathers, transposes)
# ---------------------------------------------------------------------------
def farthest_point_sample(xyz, npoint):
    # Matches CUDA furthest_point_sample: start at index 0, squared distances.
    # TODO(synk): port the sequential FPS loop to a Pallas kernel.
    B, N, _ = xyz.shape

    def body(i, state):
        idxs, mindist, far = state
        idxs = idxs.at[:, i].set(far)
        centroid = jnp.take_along_axis(
            xyz, jnp.broadcast_to(far[:, None, None], (B, 1, 3)), axis=1)
        d = jnp.sum((xyz - centroid) ** 2, axis=-1)
        mindist = jnp.minimum(mindist, d)
        far = jnp.argmax(mindist, axis=-1).astype(jnp.int32)
        return idxs, mindist, far

    idxs = jnp.zeros((B, npoint), jnp.int32)
    mindist = jnp.full((B, N), 1e10, jnp.float32)
    far = jnp.zeros((B,), jnp.int32)
    idxs, _, _ = jax.lax.fori_loop(0, npoint, body, (idxs, mindist, far))
    return idxs


def ball_query(radius, nsample, xyz, new_xyz):
    # Matches CUDA ball_query: first nsample in-radius indices in order, the
    # remaining slots filled with the first in-radius index.  Uses a partial
    # top_k instead of a full argsort over N.
    # TODO(synk): for empty balls this falls back to the lowest-index
    # out-of-radius point, a divergence from the CUDA kernel; port to Pallas.
    B, N, _ = xyz.shape
    d2 = jnp.sum((new_xyz[:, :, None, :] - xyz[:, None, :, :]) ** 2, axis=-1)
    mask = d2 < radius * radius
    ar = jnp.arange(N, dtype=jnp.int32)
    key = jnp.where(mask, ar, N + ar)                     # in-radius keys first
    neg_vals, _ = jax.lax.top_k(-key, nsample)            # nsample smallest keys
    ksel = -neg_vals                                      # ascending
    idx = jnp.where(ksel < N, ksel, ksel - N).astype(jnp.int32)
    cnt = jnp.sum(mask.astype(jnp.int32), axis=-1)        # (B, S)
    first = idx[:, :, :1]
    slot = jnp.arange(nsample, dtype=jnp.int32)
    return jnp.where(slot[None, None, :] < cnt[:, :, None], idx, first)


def group_points(data, idx):
    # data: (B, N, C), idx: (B, S, ns) -> (B, S, ns, C)
    B, S, ns = idx.shape
    C = data.shape[-1]
    flat = idx.reshape(B, S * ns)
    g = jnp.take_along_axis(
        data, jnp.broadcast_to(flat[:, :, None], (B, S * ns, C)), axis=1)
    return g.reshape(B, S, ns, C)


def sa_module_msg(xyz, features, cfg, params):
    # xyz: (B,N,3), features: (B,C,N)|None -> new_xyz (B,npoint,3), feats (B,Cout,npoint)
    B, N, _ = xyz.shape
    npoint = cfg['npoint']
    fps_idx = farthest_point_sample(xyz, npoint)
    new_xyz = jnp.take_along_axis(
        xyz, jnp.broadcast_to(fps_idx[:, :, None], (B, npoint, 3)), axis=1)
    feats_nlast = None if features is None else jnp.transpose(features, (0, 2, 1))

    ns_list = cfg['nsamples']
    ns_max = max(ns_list)      # ns is an untiled leading axis in the kernel,
    groups = []                # so no further sublane padding is needed.
    for radius, nsample in zip(cfg['radii'], ns_list):
        idx = ball_query(radius, nsample, xyz, new_xyz)
        g_xyz = group_points(xyz, idx) - new_xyz[:, :, None, :]
        if feats_nlast is not None:
            g_feat = group_points(feats_nlast, idx)
            g = jnp.concatenate([g_xyz, g_feat], axis=-1) if cfg['use_xyz'] else g_feat
        else:
            g = g_xyz
        if nsample < ns_max:
            # Pad nsample by duplicating the first neighbour (max-pool invariant).
            pad = jnp.broadcast_to(g[:, :, :1, :],
                                   (B, npoint, ns_max - nsample, g.shape[-1]))
            g = jnp.concatenate([g, pad], axis=2)
        groups.append(g)                                  # (B, npoint, ns, C)

    S = len(groups)
    C = groups[0].shape[-1]
    M = B * npoint
    # -> channels-first, point axis minor (lane-dense): (S, ns, C, B*npoint).
    g_all = jnp.stack(groups, axis=0)                     # (S, B, npoint, ns, C)
    g_all = jnp.transpose(g_all, (0, 3, 4, 1, 2)).reshape(S, ns_max, C, M)

    out_all = sa_mlp_maxpool_msg(g_all, params)           # (S, Cout_max, Mp)
    outs = []
    for s, co in enumerate(params['couts']):
        o = out_all[s, :co, :M].reshape(co, B, npoint)
        outs.append(jnp.transpose(o, (1, 0, 2)))          # (B, co, npoint)
    return new_xyz, jnp.concatenate(outs, axis=1)


def fp_module(unknown, known, unknow_feats, known_feats, layers):
    # unknown (B,n,3), known (B,m,3), unknow_feats (B,C1,n)|None, known_feats (B,C2,m)
    B, n, _ = unknown.shape
    d2 = jnp.sum((unknown[:, :, None, :] - known[:, None, :, :]) ** 2, axis=-1)
    neg, idx = jax.lax.top_k(-d2, 3)
    # PCDet's stack ThreeNN returns sqrt(dist2); weights are 1/(d + 1e-8).
    dist = jnp.sqrt(jnp.maximum(-neg, 0.0))
    recip = 1.0 / (dist + 1e-8)
    weight = recip / jnp.sum(recip, axis=2, keepdims=True)
    kf = jnp.transpose(known_feats, (0, 2, 1))             # (B, m, C2)
    g = group_points(kf, idx.astype(jnp.int32))            # (B, n, 3, C2)
    interp = jnp.sum(g * weight[..., None], axis=2)        # (B, n, C2)
    interp = jnp.transpose(interp, (0, 2, 1))              # (B, C2, n)
    new = (jnp.concatenate([interp, unknow_feats], axis=1)
           if unknow_feats is not None else interp)        # (B, C, n)
    C = new.shape[1]
    x_cf = jnp.transpose(new, (1, 0, 2)).reshape(C, B * n)  # channels-first
    y = fp_mlp(x_cf, layers)                                # (Cout, B*n) [Pallas]
    return jnp.transpose(y.reshape(-1, B, n), (1, 0, 2))    # (B, Cout, n)


# ---------------------------------------------------------------------------
# Parameter construction (deterministic, Conv2d bias=False, eval-mode BN folded,
# all weight stacking / padding / transposing / bf16 casting done ONCE here)
# ---------------------------------------------------------------------------
def _make_layer(key, cin, cout):
    kw, k1, k2, k3, k4 = jax.random.split(key, 5)
    w = (jax.random.normal(kw, (cin, cout)) / jnp.sqrt(cin)).astype(jnp.float32)
    gamma = 1.0 + 0.1 * jax.random.normal(k1, (cout,))
    beta = 0.1 * jax.random.normal(k2, (cout,))
    mean = 0.1 * jax.random.normal(k3, (cout,))
    var = 1.0 + 0.1 * jax.random.uniform(k4, (cout,))
    eps = 1e-5
    scale = (gamma / jnp.sqrt(var + eps)).astype(jnp.float32)
    shift = (beta - mean * scale).astype(jnp.float32)
    # Fold the BN scale into the conv weight; only the shift remains as a bias.
    return (w * scale[None, :]).astype(jnp.float32), shift


def build_params(key, cfg):
    channel_in = cfg['input_channels'] - 3
    sa_cfgs, sa_params = [], []
    skip = [cfg['input_channels']]           # matches skip_channel_list in the spec
    channel_out = channel_in
    for k in range(len(cfg['NPOINTS'])):
        mlps = [list(m) for m in cfg['MLPS'][k]]
        S = len(mlps)
        depth = len(mlps[0])
        assert all(len(m) == depth for m in mlps), \
            "MSG scales of one SA level must share the MLP depth"
        cin_g = channel_in + (3 if cfg['USE_XYZ'] else 0)
        raw, channel_out = [], 0
        for idx in range(S):
            dims = [cin_g] + mlps[idx]
            layers = []
            for ci_, co_ in zip(dims[:-1], dims[1:]):
                key, sub = jax.random.split(key)
                layers.append(_make_layer(sub, ci_, co_))
            raw.append(layers)
            channel_out += dims[-1]
        dims_max = [cin_g] + [max(raw[s][l][0].shape[1] for s in range(S))
                              for l in range(depth)]
        w_stacks, b_stacks = [], []
        for l in range(depth):
            ci, co = dims_max[l], dims_max[l + 1]
            w_s, b_s = [], []
            for s in range(S):
                w, sh = raw[s][l]
                wt = jnp.pad(w.T, ((0, co - w.shape[1]), (0, ci - w.shape[0])))
                w_s.append(wt)
                b_s.append(jnp.pad(sh, ((0, co - sh.shape[0]),)).reshape(co, 1))
            w_stacks.append(jnp.stack(w_s, 0).astype(jnp.bfloat16))  # (S, co, ci)
            b_stacks.append(jnp.stack(b_s, 0).astype(jnp.float32))   # (S, co, 1)
        sa_params.append(dict(w=w_stacks, b=b_stacks, n_layers=depth,
                              couts=[raw[s][-1][0].shape[1] for s in range(S)]))
        sa_cfgs.append(dict(npoint=cfg['NPOINTS'][k], radii=cfg['RADIUS'][k],
                            nsamples=cfg['NSAMPLE'][k], use_xyz=cfg['USE_XYZ']))
        skip.append(channel_out)
        channel_in = channel_out

    fp_params = []
    for k in range(len(cfg['FP_MLPS'])):
        pre = cfg['FP_MLPS'][k + 1][-1] if k + 1 < len(cfg['FP_MLPS']) else channel_out
        dims = [pre + skip[k]] + cfg['FP_MLPS'][k]
        layers = []
        for ci_, co_ in zip(dims[:-1], dims[1:]):
            key, sub = jax.random.split(key)
            w, sh = _make_layer(sub, ci_, co_)
            layers.append((w.T.astype(jnp.bfloat16),
                           sh.reshape(co_, 1).astype(jnp.float32)))
        fp_params.append(layers)
    return sa_cfgs, sa_params, fp_params


# ---------------------------------------------------------------------------
# Full forward (mirrors PointNet2Backbone.forward)
# ---------------------------------------------------------------------------
def pointnet2_msg_forward(points, batch_size, sa_cfgs, sa_params, fp_params):
    batch_idx = points[:, 0]
    xyz = points[:, 1:4]
    features = points[:, 4:] if points.shape[-1] > 4 else None
    npts = points.shape[0] // batch_size
    xyz = xyz.reshape(batch_size, npts, 3)
    if features is not None:
        features = jnp.transpose(features.reshape(batch_size, npts, -1), (0, 2, 1))
    l_xyz, l_features = [xyz], [features]
    for i in range(len(sa_cfgs)):
        li_xyz, li_feat = sa_module_msg(l_xyz[i], l_features[i],
                                        sa_cfgs[i], sa_params[i])
        l_xyz.append(li_xyz)
        l_features.append(li_feat)
    # Match PyTorch: l_features[0] = points[:, 1:]  (xyz + raw features) before FP.
    l_features[0] = jnp.transpose(points[:, 1:].reshape(batch_size, npts, -1), (0, 2, 1))
    for i in range(-1, -(len(fp_params) + 1), -1):
        l_features[i - 1] = fp_module(l_xyz[i - 1], l_xyz[i],
                                      l_features[i - 1], l_features[i], fp_params[i])
    point_features = jnp.transpose(l_features[0], (0, 2, 1)).reshape(
        -1, l_features[0].shape[1])
    point_coords = jnp.concatenate(
        [batch_idx[:, None].astype(jnp.float32), l_xyz[0].reshape(-1, 3)], axis=1)
    return point_features, point_coords


if __name__ == "__main__":
    key = jax.random.PRNGKey(0)
    cfg = dict(
        input_channels=4,                       # xyz + 1 point feature
        NPOINTS=[64, 16],
        RADIUS=[[0.2, 0.4], [0.4, 0.8]],
        NSAMPLE=[[8, 16], [8, 16]],
        MLPS=[[[8, 8, 16], [8, 8, 16]], [[16, 16, 32], [16, 16, 32]]],
        FP_MLPS=[[32, 32], [32, 32]],
        USE_XYZ=True,
    )
    kp, kx, kf = jax.random.split(key, 3)
    sa_cfgs, sa_params, fp_params = build_params(kp, cfg)

    batch_size, n_per_batch = 2, 256
    N = batch_size * n_per_batch
    xyz = jax.random.uniform(kx, (N, 3), jnp.float32)
    intensity = jax.random.uniform(kf, (N, 1), jnp.float32)
    batch_idx = jnp.repeat(jnp.arange(batch_size, dtype=jnp.float32), n_per_batch)
    points = jnp.concatenate([batch_idx[:, None], xyz, intensity], axis=1)  # (N, 5)

    point_features, point_coords = pointnet2_msg_forward(
        points, batch_size, sa_cfgs, sa_params, fp_params)
    jax.block_until_ready((point_features, point_coords))

    assert point_features.shape == (N, cfg['FP_MLPS'][0][-1])
    assert point_coords.shape == (N, 4)
    print("KERNEL_OK")
</pallas_src>

<mosaic_0001>
module attributes {stable_mosaic.version = 11 : i64} {
  func.func @kernel(%arg0: i32, %arg1: i32, %arg2: memref<1x16x4x128xbf16, #tpu.memory_space<vmem>>, %arg3: memref<1x8x4xbf16, #tpu.memory_space<vmem>>, %arg4: memref<1x8x1xf32, #tpu.memory_space<vmem>>, %arg5: memref<1x8x8xbf16, #tpu.memory_space<vmem>>, %arg6: memref<1x8x1xf32, #tpu.memory_space<vmem>>, %arg7: memref<1x16x8xbf16, #tpu.memory_space<vmem>>, %arg8: memref<1x16x1xf32, #tpu.memory_space<vmem>>, %arg9: memref<1x16x128xf32, #tpu.memory_space<vmem>>) attributes {dimension_semantics = [#tpu.dimension_semantics<parallel>, #tpu.dimension_semantics<parallel>], iteration_bounds = array<i64: 2, 1>, scalar_prefetch = 0 : i64, scratch_operands = 0 : i64, tpu.core_type = #tpu.core_type<tc>, window_params = [{transform_indices = @transform_0, window_bounds = array<i64: 1, 16, 4, 128>}, {transform_indices = @transform_1, window_bounds = array<i64: 1, 8, 4>}, {transform_indices = @transform_2, window_bounds = array<i64: 1, 8, 1>}, {transform_indices = @transform_3, window_bounds = array<i64: 1, 8, 8>}, {transform_indices = @transform_4, window_bounds = array<i64: 1, 8, 1>}, {transform_indices = @transform_5, window_bounds = array<i64: 1, 16, 8>}, {transform_indices = @transform_6, window_bounds = array<i64: 1, 16, 1>}, {transform_indices = @transform_7, window_bounds = array<i64: 1, 16, 128>}]} {
    %c0 = arith.constant 0 : index
    %c0_0 = arith.constant 0 : index
    %c0_1 = arith.constant 0 : index
    %0 = vector.load %arg3[%c0, %c0_0, %c0_1] : memref<1x8x4xbf16, #tpu.memory_space<vmem>>, vector<1x8x4xbf16>
    %1 = vector.shape_cast %0 : vector<1x8x4xbf16> to vector<8x4xbf16>
    %c0_2 = arith.constant 0 : index
    %c0_3 = arith.constant 0 : index
    %c0_4 = arith.constant 0 : index
    %2 = vector.load %arg5[%c0_2, %c0_3, %c0_4] : memref<1x8x8xbf16, #tpu.memory_space<vmem>>, vector<1x8x8xbf16>
    %3 = vector.shape_cast %2 : vector<1x8x8xbf16> to vector<8x8xbf16>
    %c0_5 = arith.constant 0 : index
    %c0_6 = arith.constant 0 : index
    %c0_7 = arith.constant 0 : index
    %4 = vector.load %arg7[%c0_5, %c0_6, %c0_7] : memref<1x16x8xbf16, #tpu.memory_space<vmem>>, vector<1x16x8xbf16>
    %5 = vector.shape_cast %4 : vector<1x16x8xbf16> to vector<16x8xbf16>
    %c0_8 = arith.constant 0 : index
    %c0_9 = arith.constant 0 : index
    %c0_10 = arith.constant 0 : index
    %6 = vector.load %arg4[%c0_8, %c0_9, %c0_10] : memref<1x8x1xf32, #tpu.memory_space<vmem>>, vector<1x8x1xf32>
    %7 = vector.shape_cast %6 : vector<1x8x1xf32> to vector<8x1xf32>
    %c0_11 = arith.constant 0 : index
    %c0_12 = arith.constant 0 : index
    %c0_13 = arith.constant 0 : index
    %8 = vector.load %arg6[%c0_11, %c0_12, %c0_13] : memref<1x8x1xf32, #tpu.memory_space<vmem>>, vector<1x8x1xf32>
    %9 = vector.shape_cast %8 : vector<1x8x1xf32> to vector<8x1xf32>
    %c0_14 = arith.constant 0 : index
    %c0_15 = arith.constant 0 : index
    %c0_16 = arith.constant 0 : index
    %10 = vector.load %arg8[%c0_14, %c0_15, %c0_16] : memref<1x16x1xf32, #tpu.memory_space<vmem>>, vector<1x16x1xf32>
    %11 = vector.shape_cast %10 : vector<1x16x1xf32> to vector<16x1xf32>
    %c0_17 = arith.constant 0 : index
    %c0_18 = arith.constant 0 : index
    %c0_19 = arith.constant 0 : index
    %c0_20 = arith.constant 0 : index
    %12 = vector.load %arg2[%c0_17, %c0_18, %c0_19, %c0_20] : memref<1x16x4x128xbf16, #tpu.memory_space<vmem>>, vector<1x1x4x128xbf16>
    %13 = vector.shape_cast %12 : vector<1x1x4x128xbf16> to vector<4x128xbf16>
    %cst = arith.constant dense<0.000000e+00> : vector<8x128xf32>
    %14 = tpu.matmul %1, %13, %cst {dimension_numbers = #tpu.dot_dimension_numbers<[1], [0], [0], [1], [0, 0, 1, 1], [], []>} : vector<8x4xbf16>, vector<4x128xbf16>, vector<8x128xf32> -> vector<8x128xf32>
    %15 = vector.broadcast %7 : vector<8x1xf32> to vector<8x128xf32>
    %16 = arith.addf %14, %15 : vector<8x128xf32>
    %cst_21 = arith.constant 0.000000e+00 : f32
    %17 = vector.broadcast %cst_21 : f32 to vector<8x128xf32>
    %18 = arith.maximumf %16, %17 : vector<8x128xf32>
    %19 = arith.truncf %18 : vector<8x128xf32> to vector<8x128xbf16>
    %cst_22 = arith.constant dense<0.000000e+00> : vector<8x128xf32>
    %20 = tpu.matmul %3, %19, %cst_22 {dimension_numbers = #tpu.dot_dimension_numbers<[1], [0], [0], [1], [0, 0, 1, 1], [], []>} : vector<8x8xbf16>, vector<8x128xbf16>, vector<8x128xf32> -> vector<8x128xf32>
    %21 = vector.broadcast %9 : vector<8x1xf32> to vector<8x128xf32>
    %22 = arith.addf %20, %21 : vector<8x128xf32>
    %cst_23 = arith.constant 0.000000e+00 : f32
    %23 = vector.broadcast %cst_23 : f32 to vector<8x128xf32>
    %24 = arith.maximumf %22, %23 : vector<8x128xf32>
    %25 = arith.truncf %24 : vector<8x128xf32> to vector<8x128xbf16>
    %cst_24 = arith.constant dense<0.000000e+00> : vector<16x128xf32>
    %26 = tpu.matmul %5, %25, %cst_24 {dimension_numbers = #tpu.dot_dimension_numbers<[1], [0], [0], [1], [0, 0, 1, 1], [], []>} : vector<16x8xbf16>, vector<8x128xbf16>, vector<16x128xf32> -> vector<16x128xf32>
    %c1_i32 = arith.constant 1 : i32
    %c15_i32 = arith.constant 15 : i32
    %27 = arith.addi %c1_i32, %c15_i32 : i32
    %c1_i32_25 = arith.constant 1 : i32
    %28 = scf.for %arg10 = %c1_i32 to %27 step %c1_i32_25 iter_args(%arg11 = %26) -> (vector<16x128xf32>)  : i32 {
      %c0_31 = arith.constant 0 : index
      %36 = arith.index_cast %arg10 : i32 to index
      %c0_32 = arith.constant 0 : index
      %c0_33 = arith.constant 0 : index
      %37 = vector.load %arg2[%c0_31, %36, %c0_32, %c0_33] : memref<1x16x4x128xbf16, #tpu.memory_space<vmem>>, vector<1x1x4x128xbf16>
      %38 = vector.shape_cast %37 : vector<1x1x4x128xbf16> to vector<4x128xbf16>
      %cst_34 = arith.constant dense<0.000000e+00> : vector<8x128xf32>
      %39 = tpu.matmul %1, %38, %cst_34 {dimension_numbers = #tpu.dot_dimension_numbers<[1], [0], [0], [1], [0, 0, 1, 1], [], []>} : vector<8x4xbf16>, vector<4x128xbf16>, vector<8x128xf32> -> vector<8x128xf32>
      %40 = vector.broadcast %7 : vector<8x1xf32> to vector<8x128xf32>
      %41 = arith.addf %39, %40 : vector<8x128xf32>
      %cst_35 = arith.constant 0.000000e+00 : f32
      %42 = vector.broadcast %cst_35 : f32 to vector<8x128xf32>
      %43 = arith.maximumf %41, %42 : vector<8x128xf32>
      %44 = arith.truncf %43 : vector<8x128xf32> to vector<8x128xbf16>
      %cst_36 = arith.constant dense<0.000000e+00> : vector<8x128xf32>
      %45 = tpu.matmul %3, %44, %cst_36 {dimension_numbers = #tpu.dot_dimension_numbers<[1], [0], [0], [1], [0, 0, 1, 1], [], []>} : vector<8x8xbf16>, vector<8x128xbf16>, vector<8x128xf32> -> vector<8x128xf32>
      %46 = vector.broadcast %9 : vector<8x1xf32> to vector<8x128xf32>
      %47 = arith.addf %45, %46 : vector<8x128xf32>
      %cst_37 = arith.constant 0.000000e+00 : f32
      %48 = vector.broadcast %cst_37 : f32 to vector<8x128xf32>
      %49 = arith.maximumf %47, %48 : vector<8x128xf32>
      %50 = arith.truncf %49 : vector<8x128xf32> to vector<8x128xbf16>
      %cst_38 = arith.constant dense<0.000000e+00> : vector<16x128xf32>
      %51 = tpu.matmul %5, %50, %cst_38 {dimension_numbers = #tpu.dot_dimension_numbers<[1], [0], [0], [1], [0, 0, 1, 1], [], []>} : vector<16x8xbf16>, vector<8x128xbf16>, vector<16x128xf32> -> vector<16x128xf32>
      %52 = arith.maximumf %arg11, %51 : vector<16x128xf32>
      scf.yield %52 : vector<16x128xf32>
    }
    %c15_i32_26 = arith.constant 15 : i32
    %29 = vector.broadcast %11 : vector<16x1xf32> to vector<16x128xf32>
    %30 = arith.addf %28, %29 : vector<16x128xf32>
    %cst_27 = arith.constant 0.000000e+00 : f32
    %31 = vector.broadcast %cst_27 : f32 to vector<16x128xf32>
    %32 = arith.maximumf %30, %31 : vector<16x128xf32>
    %c0_28 = arith.constant 0 : index
    %c0_29 = arith.constant 0 : index
    %c0_30 = arith.constant 0 : index
    %33 = vector.load %arg9[%c0_28, %c0_29, %c0_30] : memref<1x16x128xf32, #tpu.memory_space<vmem>>, vector<1x16x128xf32>
    %34 = vector.shape_cast %33 : vector<1x16x128xf32> to vector<16x128xf32>
    %35 = vector.shape_cast %32 : vector<16x128xf32> to vector<1x16x128xf32>
    tpu.vector_store %arg9[%c0_28, %c0_29, %c0_30], %35 {strides = array<i32>} : memref<1x16x128xf32, #tpu.memory_space<vmem>>, vector<1x16x128xf32>,
    return
  }
  func.func @transform_0(%arg0: i32, %arg1: i32) -> (i32, i32, i32, i32) {
    %c0_i32 = arith.constant 0 : i32
    %c0_i32_0 = arith.constant 0 : i32
    %c0_i32_1 = arith.constant 0 : i32
    return %arg0, %c0_i32, %c0_i32_0, %arg1 : i32, i32, i32, i32
  }
  func.func @transform_1(%arg0: i32, %arg1: i32) -> (i32, i32, i32) {
    %c0_i32 = arith.constant 0 : i32
    %c0_i32_0 = arith.constant 0 : i32
    %c0_i32_1 = arith.constant 0 : i32
    return %arg0, %c0_i32, %c0_i32_0 : i32, i32, i32
  }
  func.func @transform_2(%arg0: i32, %arg1: i32) -> (i32, i32, i32) {
    %c0_i32 = arith.constant 0 : i32
    %c0_i32_0 = arith.constant 0 : i32
    %c0_i32_1 = arith.constant 0 : i32
    return %arg0, %c0_i32, %c0_i32_0 : i32, i32, i32
  }
  func.func @transform_3(%arg0: i32, %arg1: i32) -> (i32, i32, i32) {
    %c0_i32 = arith.constant 0 : i32
    %c0_i32_0 = arith.constant 0 : i32
    %c0_i32_1 = arith.constant 0 : i32
    return %arg0, %c0_i32, %c0_i32_0 : i32, i32, i32
  }
  func.func @transform_4(%arg0: i32, %arg1: i32) -> (i32, i32, i32) {
    %c0_i32 = arith.constant 0 : i32
    %c0_i32_0 = arith.constant 0 : i32
    %c0_i32_1 = arith.constant 0 : i32
    return %arg0, %c0_i32, %c0_i32_0 : i32, i32, i32
  }
  func.func @transform_5(%arg0: i32, %arg1: i32) -> (i32, i32, i32) {
    %c0_i32 = arith.constant 0 : i32
    %c0_i32_0 = arith.constant 0 : i32
    %c0_i32_1 = arith.constant 0 : i32
    return %arg0, %c0_i32, %c0_i32_0 : i32, i32, i32
  }
  func.func @transform_6(%arg0: i32, %arg1: i32) -> (i32, i32, i32) {
    %c0_i32 = arith.constant 0 : i32
    %c0_i32_0 = arith.constant 0 : i32
    %c0_i32_1 = arith.constant 0 : i32
    return %arg0, %c0_i32, %c0_i32_0 : i32, i32, i32
  }
  func.func @transform_7(%arg0: i32, %arg1: i32) -> (i32, i32, i32) {
    %c0_i32 = arith.constant 0 : i32
    %c0_i32_0 = arith.constant 0 : i32
    return %arg0, %c0_i32, %arg1 : i32, i32, i32
  }
}

</mosaic_0001>

<bundles_post_ra>
// kernel: tpu_custom_call.1
= control target key start
LH: loop header
LB: loop body
LE: loop exit
PB: predicated region body
PF: predicated region fallthrough
CT: control target
= control target key end

     0   :  { %s1459_s0 = inlined_call_operand.vmem [shape: bf16[2,16,4,128], index: 0, kind: input, shape index: {}]   ;;  %s1460_s1 = inlined_call_operand.vmem [shape: bf16[2,8,4], index: 1, kind: input, shape index: {}]   ;;  %s1461_s2 = inlined_call_operand.vmem [shape: f32[2,8,1], index: 2, kind: input, shape index: {}]   ;;  %s1462_s3 = inlined_call_operand.vmem [shape: bf16[2,8,8], index: 3, kind: input, shape index: {}]   ;;  %s1463_s4 = inlined_call_operand.vmem [shape: f32[2,8,1], index: 4, kind: input, shape index: {}]   ;;  %s1464_s5 = inlined_call_operand.vmem [shape: bf16[2,16,8], index: 5, kind: input, shape index: {}]   ;;  %s1465_s6 = inlined_call_operand.vmem [shape: f32[2,16,1], index: 6, kind: input, shape index: {}]   ;;  %s1466_s7 = inlined_call_operand.hbm [shape: f32[2,16,128], index: 7, kind: output, shape index: {}]  }
   0x1   :  { %1469 = sst [smem:[#allocation6_spill]] %s1459_s0 }
   0x2   :  { %1470 = sst [smem:[#allocation7_spill]] %s1465_s6 }
   0x3   :  { %12 = vsyncpa [#allocation3], 0 }
   0x4   :  { %14 = vsyncpa [#allocation3 + $0x1], 0  ;;  %s1243_s24 = smov 0   ;;  %s1245_s25 = smov 0  }
   0x5   :  { %s1247_s26 = smov 0   ;;  %s1249_s27 = smov 0  }
   0x6   :  { %s1251_s28 = smov 0   ;;  %s1253_s29 = smov 0  }
   0x7 LB: > { %s923_s30 = sadd.s32 4294967295, %s1181_s29   ;;  %s924_s8 = sadd.s32 4294967294, %s1181_s29   ;;  %s1181_s29 = sphi %s1253_s29, %s20_s29   ;;  %s1177_s28 = sphi %s1251_s28, %s1482_s28   ;;  %s1173_s27 = sphi %s1249_s27, %s1481_s27   ;;  %s1169_s26 = sphi %s1247_s26, %s1480_s26   ;;  %s1165_s25 = sphi %s1245_s25, %s1479_s25   ;;  %s1161_s24 = sphi %s1243_s24, %s1478_s24  }
   0x8   : > { %s32_s9 = sadd.s32 1, %s1177_s28  ;;  %s225_s10 = sadd.s32 1, %s1169_s26 }
   0x9   : > { %p34_p0 = scmp.ge.s32.totalorder %s32_s9, 2  ;;  %p235_p1 = scmp.ne.s32.totalorder %s1169_s26, %s1165_s25 }
   0xa   : > { %p236_p2 = scmp.eq.s32.totalorder %s923_s30, 1  ;;  %p241_p3 = scmp.ne.s32.totalorder %s1165_s25, %s1161_s24 }
   0xb   : > { %s1484_s9 = smov (%p34_p0, %s32_s9), 0  ;;  %p242_p5 = scmp.eq.s32.totalorder %s924_s8, 1 }
   0xc   : > { %1471 = sst [smem:[#allocation5_spill]] %s1484_s9  ;;  %p1283_p4 = por %p236_p2, %p235_p1 }
   0xd   : > { %s220_s12 = ssub.s32 %s1177_s28, %s1484_s9  ;;  %p927_p6 = scmp.ge.s32.totalorder %s1181_s29, 1 }
   0xe   : > { %p223_p7 = scmp.eq.s32.totalorder %s220_s12, 0  ;;  %p1290_p8 = por %p242_p5, %p241_p3 }
   0xf   : > { %p315_p9 = scmp.lt.s32.totalorder %s1181_s29, 3 }
  0x10   : > { %s1296_s14 = scalar_select %p223_p7, %s1169_s26, %s225_s10  }
  0x11   : > { %p316_p10 = pnand %p927_p6, %p315_p9 }
  0x12   : > { %s1467_s15 = sand.u32 (!%p316_p10), 1, %s1165_s25   ;;  %p376_p11 = scmp.lt.s32.totalorder (!%p316_p10), %s1173_s27, 1 }
  0x13   : > { %319 = sbr.rel (%p316_p10) target bundleno = 1269 (0x4f5), region = 48  ;;  %s1302_s16 = sshll.u32 (!%p316_p10), %s1467_s15, 4 }
  0x14   : > { %s1474_s0 = sld [smem:[#allocation6_spill]] (!%p316_p10)  ;;  %s1375_s20 = scalar_lea.vmem (!%p316_p10), [#allocation2], %s1302_s16 }
  0x15   : > { %s1475_s6 = sld [smem:[#allocation7_spill]] (!%p316_p10) }
  0x18   : > { %v1195_v0 = vmov 0.0   ;;  %vm1196_vm0 = vmmov 0   ;;  %v1197_v1 = vmov 0   ;;  %s1307_s17 = scalar_select %p376_p11, %s1173_s27, 1  ;;  %vm429_vm1 = vcmask 1041408  }
  0x19   : > { %968 = vmatprep.subr.bf16.mxu0 %v1195_v0  ;;  %970 = vmatprep.mubr.msk.bf16.mxu0 %vm1196_vm0, %v1195_v0  ;;  %vm425_vm2 = vcmask 31744   ;;  %vm484_vm3 = vcmask 1043456   ;;  %vm480_vm4 = vcmask 64512  }
  0x1a   : > { %1090 = vset.pattern.permute.xlu0 %v1197_v1  ;;  %974 = vmatprep.subr.bf16.mxu1 %v1195_v0  ;;  %s952_s18 = sshll.u32 %s1307_s17, 5  ;;  %s954_s19 = sshll.u32 %s1307_s17, 4 }
  0x1b   : > { %976 = vmatprep.mubr.msk.bf16.mxu1 %vm1196_vm0, %v1195_v0  ;;  %s1315_s22 = scalar_lea.vmem %s1474_s0, %s952_s18  ;;  %s409_s8 = scalar_lea.vmem %s1475_s6, %s954_s19 }
  0x1c   : > { %v1320_v2 = vld [vmem:[%s409_s8] sm:$0xff]  ;;  %v1322_v3 = vld [vmem:[%s409_s8 + $0x8] sm:$0xff]  ;;  %s931_s10 = sshll.u32 %s1307_s17, 2  ;;  %s1327_s12 = sshll.u32 %s1307_s17, 3 }
  0x1d   : > { %v419_v4 = vld [vmem:[%s1315_s22] sm:$0x3]  ;;  %s387_s21 = scalar_lea.vmem %s1460_s1, %s931_s10  ;;  %s391_s19 = scalar_lea.vmem %s1461_s2, %s1327_s12 }
  0x1e   : > { %v431_v5 = vsel %vm429_vm1, %v419_v4, 0  ;;  %v1337_v6 = vld [vmem:[%s387_s21] sm:$0xf]  ;;  %s404_s15 = scalar_lea.vmem %s1464_s5, %s1327_s12  ;;  %s399_s9 = scalar_lea.vmem %s1463_s4, %s1327_s12 }
  0x1f   : > { %969 = vmatpush3.bf16.msra.mxu0 %v431_v5  ;;  %v415_v7 = vld [vmem:[%s391_s19] sm:$0xff]  ;;  %s1377_s21 = smov 1  }
  0x20   : > { %422 = vperm.xlu0 %1090, %v415_v7   ;;  %980 = vmatprep.subr.bf16.mxu0 %v1195_v0  ;;  %v416_v8 = vld [vmem:[%s399_s9] sm:$0xff]  ;;  %s395_s9 = scalar_lea.vmem %s1462_s3, %s931_s10 }
  0x21   : > { %v1357_v18 = vld [vmem:[%s395_s9] sm:$0xf] }
  0x22   : > { %971 = vmatmul.mubr.msk.bf16.vlgmr.msra.gmra.mxu0 %vm425_vm2, %v1337_v6  ;;  %v1369_v27 = vld [vmem:[%s404_s15] sm:$0xff]  }
  0x23   : > { %982 = vmatprep.mubr.msk.bf16.mxu0 %vm1196_vm0, %v1195_v0 }
  0x24   : > { %477 = vperm.xlu0 %1090, %v416_v8  }
  0x9b   : > { %v1350_v9 = vpop.permute.xlu0 %422 }
  0x9f   : > { %v1361_v19 = vpop.permute.xlu0 %477 }
  0xe2   : > { %v467_v10 = vpop.f32.mrf.mxu0 }
  0xe3   : > { %v468_v11 = vadd.f32 %v467_v10, %v1350_v9 }
  0xe4   : > { %v972_v12 = vpop.f32.mrf.mxu0 }
  0xe5   : > { %v473_v13 = vmax.f32 %v468_v11, 0.0 }
  0xe6   : > { %v470_v14 = vpop.f32.mrf.mxu0 }
  0xe7   : > { %v474_v15 = vpack.c.bf16 %v473_v13, %v473_v13 }
  0xe8   : > { %v973_v16 = vpop.f32.mrf.mxu0 }
  0xe9   : > { %v486_v17 = vsel %vm484_vm3, %v474_v15, 0 }
  0xea   : > { %975 = vmatpush3.bf16.msra.mxu1 %v486_v17 }
  0xed   : > { %977 = vmatmul.mubr.msk.bf16.vlgmr.msra.gmra.mxu1 %vm480_vm4, %v1357_v18 }
 0x1ad   : > { %v522_v20 = vpop.f32.mrf.mxu1 }
 0x1ae   : > { %v523_v21 = vadd.f32 %v522_v20, %v1361_v19 }
 0x1af   : > { %v978_v22 = vpop.f32.mrf.mxu1 }
 0x1b0   : > { %v528_v23 = vmax.f32 %v523_v21, 0.0 }
 0x1b1   : > { %v525_v24 = vpop.f32.mrf.mxu1 }
 0x1b2   : > { %v529_v25 = vpack.c.bf16 %v528_v23, %v528_v23 }
 0x1b3   : > { %v979_v26 = vpop.f32.mrf.mxu1 }
 0x1b4   : > { %v539_v28 = vsel %vm484_vm3, %v529_v25, 0 }
 0x1b5   : > { %981 = vmatpush3.bf16.msra.mxu0 %v539_v28 }
 0x1b8   : > { %983 = vmatmul.mubr.msk.bf16.vlgmr.msra.gmra.mxu0 %vm480_vm4, %v1369_v27 }
 0x278   : > { %v575_v29 = vpop.f32.mrf.mxu0  }
 0x279   : > { %v1187_v34 = vmov %v575_v29  }
 0x27a   : > { %v984_v30 = vpop.f32.mrf.mxu0 }
 0x27c   : > { %v578_v31 = vpop.f32.mrf.mxu0  }
 0x27d   : > { %v1183_v33 = vmov %v578_v31  }
 0x27e   : > { %v985_v32 = vpop.f32.mrf.mxu0 }
 0x27f LB: >> { %v1198_v35 = vmov 0.0   ;;  %vm1199_vm5 = vmmov 0   ;;  %s943_s15 = sshll.u32 %s1193_s21, 1  ;;  %s587_s21 = sadd.s32 1, %s1193_s21   ;;  %s1193_s21 = sphi %s1377_s21, %s587_s21   ;;  %v1189_v34 = vphi %v1187_v34, %v1188_v34   ;;  %v1185_v33 = vphi %v1183_v33, %v1184_v33  }
 0x280   : >> { %986 = vmatprep.subr.bf16.mxu0 %v1198_v35  ;;  %988 = vmatprep.mubr.msk.bf16.mxu0 %vm1199_vm5, %v1198_v35  ;;  %s591_s16 = scalar_lea.vmem %s1315_s22, %s943_s15  ;;  %p584_p12 = scmp.ge.s32.totalorder %s587_s21, 16  }
 0x281   : >> { %992 = vmatprep.subr.bf16.mxu1 %v1198_v35  ;;  %994 = vmatprep.mubr.msk.bf16.mxu1 %vm1199_vm5, %v1198_v35  ;;  %v592_v36 = vld [vmem:[%s591_s16] sm:$0x3]  ;;  %s955_s12 = sshll.u32 (%p584_p12), %s1173_s27, 8  ;;  %s760_s23 = sshll.u32 (%p584_p12), %s1375_s20, 4  ;;  %s1409_s23 = int_to_ptr.vmem [resolvable:$true] %s760_s23 }
 0x282   : >> { %v594_v37 = vsel %vm429_vm1, %v592_v36, 0  ;;  %1092 = vset.pattern.permute.xlu0 (%p584_p12), %v1197_v1  ;;  %s1407_s19 = scalar_lea.hbm (%p584_p12), %s1466_s7, %s955_s12  ;;  %s1476_s8 = sand.u32 (%p584_p12), 1, %s1165_s25  }
 0x283   : >> { %987 = vmatpush3.bf16.msra.mxu0 %v594_v37  ;;  %731 = vperm.xlu0 (%p584_p12), %1092, %v1320_v2   ;;  %s1414_s17 = scalar_lea.sflag (%p584_p12), [#allocation3], %s1476_s8  ;;  %s1093_s27 = scalar_lea.vmem (%p584_p12), %s1409_s23, 256 }
 0x284   : >> { %998 = vmatprep.subr.bf16.mxu0 %v1198_v35  ;;  %p1094_p13 = scmp.ne.s32.totalorder (%p584_p12), %s1409_s23, %s1093_s27  ;;  %s1200_s0 = smov (%p584_p12), [#allocation2]  }
 0x285   : > { %s1097_s6 = sshll.u32 (%p584_p12), %s1200_s0, 4  ;;  %s1098_s6 = int_to_ptr.vmem [resolvable:$false] %s1097_s6 }
 0x286   : >> { %989 = vmatmul.mubr.msk.bf16.vlgmr.msra.gmra.mxu0 %vm425_vm2, %v1337_v6  ;;  %p1095_p0 = pnand (%p584_p12), %p1094_p13, %p1283_p4  ;;  %s1099_s9 = scalar_lea.vmem (%p584_p12), %s1098_s6, 512 }
 0x287   : >> { %1000 = vmatprep.mubr.msk.bf16.mxu0 %vm1199_vm5, %v1198_v35  ;;  %736 = vperm.xlu0 (%p584_p12), %1092, %v1322_v3   ;;  %p1100_p2 = scmp.lt.s32.totalorder (%p584_p12), %s1409_s23, %s1098_s6  ;;  %p1101_p3 = scmp.lt.s32.totalorder (%p584_p12), %s1099_s9, %s1093_s27 }
 0x288   : > { %p1096_p1 = pneg (%p584_p12), %p1095_p0 }
 0x289   : > { %p1102_p5 = por (%p584_p12), %p1101_p3, %p1100_p2 }
 0x28b   : > { %p1103_p6 = pnand (%p584_p12), %p1102_p5, %p1096_p1 }
 0x2fe   : > { %v732_v60 = vpop.permute.xlu0 (%p584_p12), %731 }
 0x302   : > { %v737_v63 = vpop.permute.xlu0 (%p584_p12), %736 }
 0x346   : >> { %v630_v38 = vpop.f32.mrf.mxu0 }
 0x347   : >> { %v631_v39 = vadd.f32 %v630_v38, %v1350_v9 }
 0x348   : >> { %v990_v40 = vpop.f32.mrf.mxu0 }
 0x349   : >> { %v636_v41 = vmax.f32 %v631_v39, 0.0 }
 0x34a   : >> { %v633_v42 = vpop.f32.mrf.mxu0 }
 0x34b   : >> { %v637_v43 = vpack.c.bf16 %v636_v41, %v636_v41 }
 0x34c   : >> { %v991_v44 = vpop.f32.mrf.mxu0 }
 0x34d   : >> { %v639_v45 = vsel %vm484_vm3, %v637_v43, 0 }
 0x34e   : >> { %993 = vmatpush3.bf16.msra.mxu1 %v639_v45 }
 0x351   : >> { %995 = vmatmul.mubr.msk.bf16.vlgmr.msra.gmra.mxu1 %vm480_vm4, %v1357_v18 }
 0x411   : >> { %v675_v46 = vpop.f32.mrf.mxu1 }
 0x412   : >> { %v676_v47 = vadd.f32 %v675_v46, %v1361_v19 }
 0x413   : >> { %v996_v48 = vpop.f32.mrf.mxu1 }
 0x414   : >> { %v681_v49 = vmax.f32 %v676_v47, 0.0 }
 0x415   : >> { %v678_v50 = vpop.f32.mrf.mxu1 }
 0x416   : >> { %v682_v51 = vpack.c.bf16 %v681_v49, %v681_v49 }
 0x417   : >> { %v997_v52 = vpop.f32.mrf.mxu1 }
 0x418   : >> { %v684_v53 = vsel %vm484_vm3, %v682_v51, 0 }
 0x419   : >> { %999 = vmatpush3.bf16.msra.mxu0 %v684_v53 }
 0x41c   : >> { %1001 = vmatmul.mubr.msk.bf16.vlgmr.msra.gmra.mxu0 %vm480_vm4, %v1369_v27 }
 0x4dc   : >> { %v720_v54 = vpop.f32.mrf.mxu0 }
 0x4dd   : >> { %v727_v55 = vmax.f32 %v1189_v34, %v720_v54  }
 0x4de   : >> { %v1002_v56 = vpop.f32.mrf.mxu0 }
 0x4df   : >> { %v1188_v34 = vmov %v727_v55   ;;  %586 = sbr.rel (!%p584_p12) target bundleno = 639 (0x27f), region = 109  ;;  %v739_v61 = vadd.f32 (%p584_p12), %v732_v60, %v727_v55 }
 0x4e0   : >> { %v723_v57 = vpop.f32.mrf.mxu0 }
 0x4e1   : >> { %v728_v58 = vmax.f32 %v1185_v33, %v723_v57   ;;  %v741_v62 = vmax.f32 (%p584_p12), %v739_v61, 0.0 }
 0x4e2   : >> { %v1003_v59 = vpop.f32.mrf.mxu0 }
 0x4e3   : >> { %v1184_v33 = vmov %v728_v58   ;;  %743 = vst [vmem:[%s1375_s20] sm:$0xff] (%p584_p12), %v741_v62  ;;  %v740_v0 = vadd.f32 (%p584_p12), %v737_v63, %v728_v58 }
 0x4e5   : > { %v742_v1 = vmax.f32 %v740_v0, 0.0 }
 0x4e7   : > { %744 = vst [vmem:[%s1375_s20 + $0x8] sm:$0xff] %v742_v1 }
 0x4e8   : > { %1106 = shalt.err (!%p1103_p6)
}
 0x4e9   : > { %s1107_s10 = scalar_lea.hbm %s1407_s19, 256  ;;  %s1111_s21 = scalar_lea.hbm %s1466_s7, 512 }
 0x4ea   : > { %p1108_p7 = scmp.ne.s32.totalorder %s1407_s19, %s1107_s10  ;;  %p1112_p11 = scmp.lt.s32.totalorder %s1407_s19, %s1466_s7 }
 0x4eb   : > { %p1113_p12 = scmp.lt.s32.totalorder %s1111_s21, %s1107_s10 }
 0x4ec   : > { %p1109_p9 = pnand %p1108_p7, %p1283_p4 }
 0x4ed   : > { %p1114_p13 = por %p1113_p12, %p1112_p11 }
 0x4ee   : > { %p1110_p10 = pneg %p1109_p9 }
 0x4f0   : > { %p1115_p0 = pnand %p1114_p13, %p1110_p10 }
 0x4f2   : > { %1118 = shalt.err (!%p1115_p0)
}
 0x4f3   : > { %s1201_s12 = smov 128   ;;  %s1202_s22 = smov 8  }
 0x4f4   : > { %1004 = dma.vmem_to_hbm [thread:$0]  (%p1283_p4), %s1409_s23, 256, %s1407_s19, %s1414_s17, %s1201_s12, %s1201_s12, %s1202_s22  }
 0x4f5 PF: > { %p1010_p1 = scmp.ge.s32.totalorder %s1181_s29, 2  ;;  %s775_s30 = sand.u32 1, %s1161_s24  }
 0x4f6   : > { %s776_s8 = scalar_lea.sflag [#allocation3], %s775_s30 }
 0x4f7   : > { %p1007_p2 = pnand %p1010_p1, %p1290_p8 }
 0x4f9   : > { %p1008_p3 = pneg %p1007_p2 }
 0x4fb   : > { %1156 = dma.done.wait (%p1008_p3), %s776_s8, 256  }
 0x4fc   : > { %1158 = vsyncadd (%p1008_p3), %s776_s8, 4294967040  ;;  %s20_s29 = sadd.s32 1, %s1181_s29   ;;  %s1477_s11 = sld [smem:[#allocation5_spill]] }
 0x4fd   : > { %p17_p5 = scmp.ge.s32.totalorder %s20_s29, 4   ;;  %s1478_s24 = smov %s1165_s25 }
 0x4fe   : > { %s1479_s25 = smov %s1169_s26  ;;  %s1480_s26 = smov %s1296_s14 }
 0x4ff   : > { %s1481_s27 = smov %s1177_s28  ;;  %19 = sbr.rel (!%p17_p5) target bundleno = 7 (0x7), region = 120 }
 0x502   : > { %s1482_s28 = smov %s1477_s11 }
 0x504   :  { %781 = vsyncpa [#allocation3], 1 }
 0x505   :  { %783 = vsyncpa [#allocation3 + $0x1], 1 }

</bundles_post_ra>
